<compile_context>
chip_gen: v7x
topology: tpu7x:2x2x1
jax: 0.10.0
libtpu: 0.0.40
codegen_flags: <defaults>
</compile_context>

<pallas_src>
import functools
import math

import jax
import jax.numpy as jnp
from jax import lax
from jax.experimental import pallas as pl
from jax.experimental.pallas import tpu as pltpu


# ----------------------------- Pallas kernel --------------------------------
def _mha_conv_shuffle_kernel(patches_ref, wqkv_ref, out_ref, attn_ref, *,
                             num_heads, d_model, bblk):
    C = num_heads * d_model
    scale = 1.0 / math.sqrt(float(num_heads))

    w = wqkv_ref[...]                                   # (3C, Kdim) bf16

    for bb in range(bblk):                              # static unrolled loop
        p = patches_ref[bb]                             # (Kdim, L) bf16

        # Fused Q/K/V conv projection: one MXU matmul, f32 accumulation.
        qkv = jnp.dot(w, p, preferred_element_type=jnp.float32)   # (3C, L) f32

        q = qkv[0:C]                                    # (C, L)
        k = qkv[C:2 * C]                                # (C, L)
        v = qkv[2 * C:3 * C]                            # (C, L)

        L = q.shape[-1]
        qh = q.reshape(num_heads, d_model, L)           # (nh, d, L)
        kh = k.reshape(num_heads, d_model, L)
        vh = v.reshape(num_heads, d_model, L)

        # scores[h, a, b] = sum_l Q[h, a, l] * K[h, b, l]  (all heads at once)
        scores = lax.dot_general(
            qh, kh, (((2,), (2,)), ((0,), (0,))),
            preferred_element_type=jnp.float32) * scale  # (nh, d, d)

        # numerically stable softmax along last dim (matches torch softmax)
        scores = scores - jnp.max(scores, axis=-1, keepdims=True)
        e = jnp.exp(scores)
        attn_w = e / jnp.sum(e, axis=-1, keepdims=True)  # (nh, d, d) f32

        attn_ref[bb, :, :, :] = attn_w

        # attn_out[h, a, l] = sum_b attn_w[h, a, b] * V[h, b, l]
        ao = lax.dot_general(
            attn_w, vh, (((2,), (1,)), ((0,), (0,))),
            preferred_element_type=jnp.float32)          # (nh, d, L)

        # ChannelShuffle(num_heads): output row j*nh + i  <-  ao[i, j, :]
        shuf = jnp.swapaxes(ao, 0, 1).reshape(C, L)      # (C, L)

        # residual add with value projection, lane-dense (C, L) store.
        out_ref[bb, :, :] = (shuf + v).astype(out_ref.dtype)


# ------------------------------- wrapper -------------------------------------
def _im2col_cf(x, kh, kw, stride, padding):
    """x: (B, C, H, W) -> patches (B, C*kh*kw, L); feature idx = ci*kh*kw + r*kw + s."""
    B, C, H, W = x.shape
    xp = jnp.pad(x, ((0, 0), (0, 0), (padding, padding), (padding, padding)))
    Ho = (H + 2 * padding - kh) // stride + 1
    Wo = (W + 2 * padding - kw) // stride + 1
    slices = []
    for r in range(kh):
        for s in range(kw):
            sl = xp[:, :, r:r + Ho * stride:stride, s:s + Wo * stride:stride]  # (B,C,Ho,Wo)
            slices.append(sl)
    stacked = jnp.stack(slices, axis=2)                  # (B, C, kh*kw, Ho, Wo)
    patches = stacked.reshape(B, C * kh * kw, Ho * Wo)   # (B, Kdim, L) — no transpose
    return patches, Ho, Wo


def mha_conv_shuffle(x, wq, wk, wv, *, num_heads, stride=1, padding=0):
    """x: (B, Cin, H, W) NCHW;  wq/wk/wv: (Cout, Cin, kh, kw) OIHW conv weights.

    Returns (attn_output (B, Cout, Ho, Wo), attn_weights (B, num_heads, d, d)).
    """
    B = x.shape[0]
    cout, cin, kh, kw = wq.shape
    d_model = cout // num_heads

    patches, Ho, Wo = _im2col_cf(x.astype(jnp.float32), kh, kw, stride, padding)
    L = Ho * Wo
    kdim = cin * kh * kw

    # bf16 matmul operands (f32 accumulation inside the kernel).
    patches = patches.astype(jnp.bfloat16)
    wqkv = jnp.concatenate([wq, wk, wv], axis=0).reshape(3 * cout, kdim)
    wqkv = wqkv.astype(jnp.bfloat16)

    # Batch-block size: largest divisor of B that is <= 8 (amortize step overhead).
    bblk = next(c for c in range(min(B, 8), 0, -1) if B % c == 0)

    kernel = functools.partial(_mha_conv_shuffle_kernel,
                               num_heads=num_heads, d_model=d_model, bblk=bblk)

    out_cl, attn_w = pl.pallas_call(
        kernel,
        out_shape=(
            jax.ShapeDtypeStruct((B, cout, L), jnp.float32),
            jax.ShapeDtypeStruct((B, num_heads, d_model, d_model), jnp.float32),
        ),
        grid=(B // bblk,),
        in_specs=[
            pl.BlockSpec((bblk, kdim, L), lambda b: (b, 0, 0)),
            pl.BlockSpec((3 * cout, kdim), lambda b: (0, 0)),
        ],
        out_specs=(
            pl.BlockSpec((bblk, cout, L), lambda b: (b, 0, 0)),
            pl.BlockSpec((bblk, num_heads, d_model, d_model),
                         lambda b: (b, 0, 0, 0)),
        ),
        compiler_params=pltpu.CompilerParams(
            dimension_semantics=("parallel",)),
    )(patches, wqkv)

    # (B, Cout, L) -> (B, Cout, Ho, Wo): pure reshape, no data movement.
    return out_cl.reshape(B, cout, Ho, Wo), attn_w


# --------------------------- pure-JAX reference -------------------------------
def reference(x, wq, wk, wv, *, num_heads, stride=1, padding=0):
    cout = wq.shape[0]
    d_model = cout // num_heads
    dn = ("NCHW", "OIHW", "NCHW")
    conv = lambda w: lax.conv_general_dilated(
        x, w, (stride, stride), [(padding, padding), (padding, padding)],
        dimension_numbers=dn)
    qc, kc, vc = conv(wq), conv(wk), conv(wv)
    B, _, Ho, Wo = vc.shape
    q = qc.reshape(B, num_heads, d_model, -1)
    k = kc.reshape(B, num_heads, d_model, -1)
    scores = jnp.matmul(q, jnp.swapaxes(k, -1, -2)) / math.sqrt(float(num_heads))
    aw = jax.nn.softmax(scores, axis=-1)
    ao = jnp.matmul(aw, vc.reshape(B, num_heads, d_model, -1))
    ao = ao.reshape(vc.shape)
    # ChannelShuffle(num_heads)
    shuf = ao.reshape(B, num_heads, d_model, Ho, Wo).transpose(0, 2, 1, 3, 4)
    shuf = shuf.reshape(B, cout, Ho, Wo)
    return shuf + vc, aw


# --------------------------------- main ---------------------------------------
if __name__ == "__main__":
    # module config: num_heads=2, in_channels=4, out_channels=8, kernel=3, pad=1
    num_heads = 2
    in_channels = 4
    out_channels = 8
    kernel_size = 3
    stride = 1
    padding = 1
    B, H, W = 2, 16, 16

    key = jax.random.PRNGKey(0)
    kx, k1, k2, k3 = jax.random.split(key, 4)
    x = jax.random.normal(kx, (B, in_channels, H, W), jnp.float32)
    wshape = (out_channels, in_channels, kernel_size, kernel_size)
    fan_in = in_channels * kernel_size * kernel_size
    wscale = 1.0 / math.sqrt(fan_in)
    wq = wscale * jax.random.normal(k1, wshape, jnp.float32)
    wk = wscale * jax.random.normal(k2, wshape, jnp.float32)
    wv = wscale * jax.random.normal(k3, wshape, jnp.float32)

    # Make inputs bf16-representable so the f32 reference and the bf16-operand
    # Pallas kernel see identical values (kernel accumulates in f32).
    rnd = lambda a: a.astype(jnp.bfloat16).astype(jnp.float32)
    x, wq, wk, wv = rnd(x), rnd(wq), rnd(wk), rnd(wv)

    out, attn = mha_conv_shuffle(x, wq, wk, wv, num_heads=num_heads,
                                 stride=stride, padding=padding)
    out = jax.block_until_ready(out)
    attn = jax.block_until_ready(attn)

    ref_out, ref_attn = reference(x, wq, wk, wv, num_heads=num_heads,
                                  stride=stride, padding=padding)

    assert out.shape == (B, out_channels, H, W), out.shape
    assert attn.shape == (B, num_heads, out_channels // num_heads,
                          out_channels // num_heads), attn.shape
    assert jnp.allclose(out, ref_out, atol=1e-3, rtol=1e-3)
    assert jnp.allclose(attn, ref_attn, atol=1e-3, rtol=1e-3)

    print("KERNEL_OK")
</pallas_src>

<mosaic_0001>
module attributes {stable_mosaic.version = 11 : i64} {
  func.func @_mha_conv_shuffle_kernel(%arg0: i32, %arg1: memref<2x36x256xbf16, #tpu.memory_space<vmem>>, %arg2: memref<24x36xbf16, #tpu.memory_space<vmem>>, %arg3: memref<2x8x256xf32, #tpu.memory_space<vmem>>, %arg4: memref<2x2x4x4xf32, #tpu.memory_space<vmem>>) attributes {dimension_semantics = [#tpu.dimension_semantics<parallel>], iteration_bounds = array<i64: 1>, scalar_prefetch = 0 : i64, scratch_operands = 0 : i64, tpu.core_type = #tpu.core_type<tc>, window_params = [{transform_indices = @transform_0, window_bounds = array<i64: 2, 36, 256>}, {pipeline_mode = #tpu.pipeline_mode<synchronous>, transform_indices = @transform_1, window_bounds = array<i64: 24, 36>}, {transform_indices = @transform_2, window_bounds = array<i64: 2, 8, 256>}, {transform_indices = @transform_3, window_bounds = array<i64: 2, 2, 4, 4>}]} {
    %c0 = arith.constant 0 : index
    %c0_0 = arith.constant 0 : index
    %0 = vector.load %arg2[%c0, %c0_0] : memref<24x36xbf16, #tpu.memory_space<vmem>>, vector<24x36xbf16>
    %c0_1 = arith.constant 0 : index
    %c0_2 = arith.constant 0 : index
    %c0_3 = arith.constant 0 : index
    %1 = vector.load %arg1[%c0_1, %c0_2, %c0_3] : memref<2x36x256xbf16, #tpu.memory_space<vmem>>, vector<1x36x256xbf16>
    %2 = vector.shape_cast %1 : vector<1x36x256xbf16> to vector<36x256xbf16>
    %cst = arith.constant dense<0.000000e+00> : vector<24x256xf32>
    %3 = tpu.matmul %0, %2, %cst {dimension_numbers = #tpu.dot_dimension_numbers<[1], [0], [0], [1], [0, 0, 1, 1], [], []>} : vector<24x36xbf16>, vector<36x256xbf16>, vector<24x256xf32> -> vector<24x256xf32>
    %4 = vector.extract_strided_slice %3 {offsets = [0, 0], sizes = [8, 256], strides = [1, 1]} : vector<24x256xf32> to vector<8x256xf32>
    %5 = vector.extract_strided_slice %3 {offsets = [8, 0], sizes = [8, 256], strides = [1, 1]} : vector<24x256xf32> to vector<8x256xf32>
    %6 = vector.extract_strided_slice %3 {offsets = [16, 0], sizes = [8, 256], strides = [1, 1]} : vector<24x256xf32> to vector<8x256xf32>
    %7 = vector.shape_cast %4 : vector<8x256xf32> to vector<2x4x256xf32>
    %8 = vector.shape_cast %5 : vector<8x256xf32> to vector<2x4x256xf32>
    %9 = vector.shape_cast %6 : vector<8x256xf32> to vector<2x4x256xf32>
    %cst_4 = arith.constant dense<0.000000e+00> : vector<2x4x4xf32>
    %10 = tpu.matmul %7, %8, %cst_4 {dimension_numbers = #tpu.dot_dimension_numbers<[2], [2], [1], [1], [0, 0, 0, 1, 1, 1], [0], [0]>} : vector<2x4x256xf32>, vector<2x4x256xf32>, vector<2x4x4xf32> -> vector<2x4x4xf32>
    %cst_5 = arith.constant 0.707106769 : f32
    %11 = vector.broadcast %cst_5 : f32 to vector<2x4x4xf32>
    %12 = arith.mulf %10, %11 : vector<2x4x4xf32>
    %cst_6 = arith.constant dense<0xFF800000> : vector<2x4xf32>
    %13 = vector.multi_reduction <maximumf>, %12, %cst_6 [2] : vector<2x4x4xf32> to vector<2x4xf32>
    %14 = vector.shape_cast %13 : vector<2x4xf32> to vector<2x4x1xf32>
    %15 = vector.broadcast %14 : vector<2x4x1xf32> to vector<2x4x4xf32>
    %16 = arith.subf %12, %15 : vector<2x4x4xf32>
    %17 = math.exp %16 : vector<2x4x4xf32>
    %cst_7 = arith.constant dense<0.000000e+00> : vector<2x4xf32>
    %18 = vector.multi_reduction <add>, %17, %cst_7 [2] : vector<2x4x4xf32> to vector<2x4xf32>
    %19 = vector.shape_cast %18 : vector<2x4xf32> to vector<2x4x1xf32>
    %20 = vector.broadcast %19 : vector<2x4x1xf32> to vector<2x4x4xf32>
    %21 = arith.divf %17, %20 : vector<2x4x4xf32>
    %c0_8 = arith.constant 0 : index
    %c0_9 = arith.constant 0 : index
    %c0_10 = arith.constant 0 : index
    %c0_11 = arith.constant 0 : index
    %22 = vector.load %arg4[%c0_8, %c0_9, %c0_10, %c0_11] : memref<2x2x4x4xf32, #tpu.memory_space<vmem>>, vector<1x2x4x4xf32>
    %23 = vector.shape_cast %22 : vector<1x2x4x4xf32> to vector<2x4x4xf32>
    %24 = vector.shape_cast %21 : vector<2x4x4xf32> to vector<1x2x4x4xf32>
    tpu.vector_store %arg4[%c0_8, %c0_9, %c0_10, %c0_11], %24 {strides = array<i32>} : memref<2x2x4x4xf32, #tpu.memory_space<vmem>>, vector<1x2x4x4xf32>,
    %cst_12 = arith.constant dense<0.000000e+00> : vector<2x4x256xf32>
    %25 = tpu.matmul %21, %9, %cst_12 {dimension_numbers = #tpu.dot_dimension_numbers<[2], [1], [1], [2], [0, 0, 0, 1, 1, 2], [0], [0]>} : vector<2x4x4xf32>, vector<2x4x256xf32>, vector<2x4x256xf32> -> vector<2x4x256xf32>
    %26 = tpu.transpose %25, [1, 0, 2] : vector<2x4x256xf32> -> vector<4x2x256xf32>
    %27 = vector.shape_cast %26 : vector<4x2x256xf32> to vector<8x256xf32>
    %28 = arith.addf %27, %6 : vector<8x256xf32>
    %c0_13 = arith.constant 0 : index
    %c0_14 = arith.constant 0 : index
    %c0_15 = arith.constant 0 : index
    %29 = vector.load %arg3[%c0_13, %c0_14, %c0_15] : memref<2x8x256xf32, #tpu.memory_space<vmem>>, vector<1x8x256xf32>
    %30 = vector.shape_cast %29 : vector<1x8x256xf32> to vector<8x256xf32>
    %31 = vector.shape_cast %28 : vector<8x256xf32> to vector<1x8x256xf32>
    tpu.vector_store %arg3[%c0_13, %c0_14, %c0_15], %31 {strides = array<i32>} : memref<2x8x256xf32, #tpu.memory_space<vmem>>, vector<1x8x256xf32>,
    %c1 = arith.constant 1 : index
    %c0_16 = arith.constant 0 : index
    %c0_17 = arith.constant 0 : index
    %32 = vector.load %arg1[%c1, %c0_16, %c0_17] : memref<2x36x256xbf16, #tpu.memory_space<vmem>>, vector<1x36x256xbf16>
    %33 = vector.shape_cast %32 : vector<1x36x256xbf16> to vector<36x256xbf16>
    %cst_18 = arith.constant dense<0.000000e+00> : vector<24x256xf32>
    %34 = tpu.matmul %0, %33, %cst_18 {dimension_numbers = #tpu.dot_dimension_numbers<[1], [0], [0], [1], [0, 0, 1, 1], [], []>} : vector<24x36xbf16>, vector<36x256xbf16>, vector<24x256xf32> -> vector<24x256xf32>
    %35 = vector.extract_strided_slice %34 {offsets = [0, 0], sizes = [8, 256], strides = [1, 1]} : vector<24x256xf32> to vector<8x256xf32>
    %36 = vector.extract_strided_slice %34 {offsets = [8, 0], sizes = [8, 256], strides = [1, 1]} : vector<24x256xf32> to vector<8x256xf32>
    %37 = vector.extract_strided_slice %34 {offsets = [16, 0], sizes = [8, 256], strides = [1, 1]} : vector<24x256xf32> to vector<8x256xf32>
    %38 = vector.shape_cast %35 : vector<8x256xf32> to vector<2x4x256xf32>
    %39 = vector.shape_cast %36 : vector<8x256xf32> to vector<2x4x256xf32>
    %40 = vector.shape_cast %37 : vector<8x256xf32> to vector<2x4x256xf32>
    %cst_19 = arith.constant dense<0.000000e+00> : vector<2x4x4xf32>
    %41 = tpu.matmul %38, %39, %cst_19 {dimension_numbers = #tpu.dot_dimension_numbers<[2], [2], [1], [1], [0, 0, 0, 1, 1, 1], [0], [0]>} : vector<2x4x256xf32>, vector<2x4x256xf32>, vector<2x4x4xf32> -> vector<2x4x4xf32>
    %cst_20 = arith.constant 0.707106769 : f32
    %42 = vector.broadcast %cst_20 : f32 to vector<2x4x4xf32>
    %43 = arith.mulf %41, %42 : vector<2x4x4xf32>
    %cst_21 = arith.constant dense<0xFF800000> : vector<2x4xf32>
    %44 = vector.multi_reduction <maximumf>, %43, %cst_21 [2] : vector<2x4x4xf32> to vector<2x4xf32>
    %45 = vector.shape_cast %44 : vector<2x4xf32> to vector<2x4x1xf32>
    %46 = vector.broadcast %45 : vector<2x4x1xf32> to vector<2x4x4xf32>
    %47 = arith.subf %43, %46 : vector<2x4x4xf32>
    %48 = math.exp %47 : vector<2x4x4xf32>
    %cst_22 = arith.constant dense<0.000000e+00> : vector<2x4xf32>
    %49 = vector.multi_reduction <add>, %48, %cst_22 [2] : vector<2x4x4xf32> to vector<2x4xf32>
    %50 = vector.shape_cast %49 : vector<2x4xf32> to vector<2x4x1xf32>
    %51 = vector.broadcast %50 : vector<2x4x1xf32> to vector<2x4x4xf32>
    %52 = arith.divf %48, %51 : vector<2x4x4xf32>
    %c1_23 = arith.constant 1 : index
    %c0_24 = arith.constant 0 : index
    %c0_25 = arith.constant 0 : index
    %c0_26 = arith.constant 0 : index
    %53 = vector.load %arg4[%c1_23, %c0_24, %c0_25, %c0_26] : memref<2x2x4x4xf32, #tpu.memory_space<vmem>>, vector<1x2x4x4xf32>
    %54 = vector.shape_cast %53 : vector<1x2x4x4xf32> to vector<2x4x4xf32>
    %55 = vector.shape_cast %52 : vector<2x4x4xf32> to vector<1x2x4x4xf32>
    tpu.vector_store %arg4[%c1_23, %c0_24, %c0_25, %c0_26], %55 {strides = array<i32>} : memref<2x2x4x4xf32, #tpu.memory_space<vmem>>, vector<1x2x4x4xf32>,
    %cst_27 = arith.constant dense<0.000000e+00> : vector<2x4x256xf32>
    %56 = tpu.matmul %52, %40, %cst_27 {dimension_numbers = #tpu.dot_dimension_numbers<[2], [1], [1], [2], [0, 0, 0, 1, 1, 2], [0], [0]>} : vector<2x4x4xf32>, vector<2x4x256xf32>, vector<2x4x256xf32> -> vector<2x4x256xf32>
    %57 = tpu.transpose %56, [1, 0, 2] : vector<2x4x256xf32> -> vector<4x2x256xf32>
    %58 = vector.shape_cast %57 : vector<4x2x256xf32> to vector<8x256xf32>
    %59 = arith.addf %58, %37 : vector<8x256xf32>
    %c1_28 = arith.constant 1 : index
    %c0_29 = arith.constant 0 : index
    %c0_30 = arith.constant 0 : index
    %60 = vector.load %arg3[%c1_28, %c0_29, %c0_30] : memref<2x8x256xf32, #tpu.memory_space<vmem>>, vector<1x8x256xf32>
    %61 = vector.shape_cast %60 : vector<1x8x256xf32> to vector<8x256xf32>
    %62 = vector.shape_cast %59 : vector<8x256xf32> to vector<1x8x256xf32>
    tpu.vector_store %arg3[%c1_28, %c0_29, %c0_30], %62 {strides = array<i32>} : memref<2x8x256xf32, #tpu.memory_space<vmem>>, vector<1x8x256xf32>,
    return
  }
  func.func @transform_0(%arg0: i32) -> (i32, i32, i32) {
    %c0_i32 = arith.constant 0 : i32
    %c0_i32_0 = arith.constant 0 : i32
    %c0_i32_1 = arith.constant 0 : i32
    return %arg0, %c0_i32, %c0_i32_0 : i32, i32, i32
  }
  func.func @transform_1(%arg0: i32) -> (i32, i32) {
    %c0_i32 = arith.constant 0 : i32
    %c0_i32_0 = arith.constant 0 : i32
    %c0_i32_1 = arith.constant 0 : i32
    return %c0_i32, %c0_i32_0 : i32, i32
  }
  func.func @transform_2(%arg0: i32) -> (i32, i32, i32) {
    %c0_i32 = arith.constant 0 : i32
    %c0_i32_0 = arith.constant 0 : i32
    %c0_i32_1 = arith.constant 0 : i32
    return %arg0, %c0_i32, %c0_i32_0 : i32, i32, i32
  }
  func.func @transform_3(%arg0: i32) -> (i32, i32, i32, i32) {
    %c0_i32 = arith.constant 0 : i32
    %c0_i32_0 = arith.constant 0 : i32
    %c0_i32_1 = arith.constant 0 : i32
    %c0_i32_2 = arith.constant 0 : i32
    return %arg0, %c0_i32, %c0_i32_0, %c0_i32_1 : i32, i32, i32, i32
  }
}

</mosaic_0001>

<bundles_post_ra>
// kernel: tpu_custom_call.1
= control target key start
LH: loop header
LB: loop body
LE: loop exit
PB: predicated region body
PF: predicated region fallthrough
CT: control target
= control target key end

     0   :  { %9 = vsyncpa [#allocation3], 0  ;;  %v1404_v2 = vmov 0   ;;  %vm64_vm0 = vcmask 1041408   ;;  %s1574_s0 = inlined_call_operand.vmem [shape: bf16[2,36,256], index: 0, kind: input, shape index: {}]   ;;  %s1575_s1 = inlined_call_operand.vmem [shape: bf16[24,36], index: 1, kind: input, shape index: {}]   ;;  %s1576_s2 = inlined_call_operand.hbm [shape: f32[2,8,256], index: 2, kind: output, shape index: {0}]   ;;  %s1577_s3 = inlined_call_operand.hbm [shape: f32[2,2,4,4], index: 3, kind: output, shape index: {1}]  }
   0x1   :  { %v1322_v0 = vld [vmem:[%s1574_s0 + $0x4] ss:$8 sps:$4 sm:$0xff]   ;;  %v1324_v1 = vld [vmem:[%s1574_s0] ss:$8 sps:$4 sm:$0xff]   ;;  %103 = vmatprep.mubr.bf16.mxu0 %v1404_v2  ;;  %v1325_v3 = vld [vmem:[%s1574_s0 + $0x14] ss:$8 sps:$4 sm:$0xff]  }
   0x2   :  { %71 = vmatprep.subr.bf16.mxu0 %v1322_v0  ;;  %v23_v4 = vld [vmem:[%s1574_s0 + $0x20] sm:$0x33]  ;;  %v1327_v5 = vld [vmem:[%s1574_s0 + $0x10] ss:$8 sps:$4 sm:$0xff]  }
   0x3   :  { %72 = vmatpush1.bf16.msra.mxu0 %v1324_v1  ;;  %v1266_v6 = vcombine.high %v23_v4, %v23_v4  ;;  %v1265_v7 = vcombine.low %v23_v4, %v23_v4 }
   0x4   :  { %73 = vmatprep.subr.bf16.mxu0 %v1325_v3 }
   0x5   :  { %10 = vsyncpa [#allocation5], 0  ;;  %v66_v8 = vsel %vm64_vm0, %v1265_v7, 0  ;;  %v1330_v9 = vld [vmem:[%s1575_s1] sm:$0xff]   ;;  %vm57_vm1 = vcmask 293888   ;;  %vm288_vm2 = vcmask 27648  }
   0x6   :  { %v1331_v22 = vld [vmem:[%s1574_s0 + $0x28] ss:$8 sps:$4 sm:$0xff]   ;;  %v1333_v23 = vld [vmem:[%s1574_s0 + $0x2c] ss:$8 sps:$4 sm:$0xff]   ;;  %v1337_v25 = vld [vmem:[%s1574_s0 + $0x3c] ss:$8 sps:$4 sm:$0xff]  }
   0x7   :  { %74 = vmatpush1.bf16.msra.mxu0 %v1327_v5  ;;  %v1334_v24 = vld [vmem:[%s1575_s1 + $0x8] ss:$0 sps:$4 sm:$0xff]   ;;  %v1335_v27 = vld [vmem:[%s1574_s0 + $0x38] ss:$8 sps:$4 sm:$0xff]   ;;  %vm318_vm3 = vcmask 1043456   ;;  %v1405_v59 = vmov 0.0  }
   0x8   :  { %1267 = vmatprep.subr.msk.bf16.mxu0 %vm64_vm0, %v1266_v6  ;;  %v1288_v26 = vld [vmem:[%s1574_s0 + $0x48] sm:$0x33]  ;;  %vm314_vm4 = vcmask 31744   ;;  %s1408_s0 = smov [#allocation4]  }
   0x9   :  { %v1294_v28 = vcombine.high %v1288_v26, %v1288_v26  ;;  %v1293_v29 = vcombine.low %v1288_v26, %v1288_v26  ;;  %s1244_s1 = sshll.u32 %s1408_s0, 4  ;;  %s1245_s1 = int_to_ptr.vmem [resolvable:$true] %s1244_s1 }
   0xa   :  { %s1356_s9 = scalar_lea.vmem %s1245_s1, 256  ;;  %p1361_p1 = scmp.lt.s32.totalorder %s1245_s1, %s1245_s1 }
   0xb   :  { %76 = vmatpush1.bf16.msra.mxu0 %v66_v8  ;;  %v663_v30 = vsel %vm64_vm0, %v1293_v29, 0  ;;  %p1357_p0 = scmp.ne.s32.totalorder %s1245_s1, %s1356_s9  ;;  %p1362_p2 = scmp.lt.s32.totalorder %s1356_s9, %s1356_s9 }
   0xc   :  { %668 = vmatprep.subr.bf16.mxu0 %v1333_v23 }
   0xd   :  { %p1363_p3 = por %p1362_p2, %p1361_p1 }
   0xe   :  { %1268 = vmatmul.mubr.msk.bf16.vlgmr.msra.gmra.mrb[0].mxu0 %vm57_vm1, %v1330_v9 }
   0xf   :  { %113 = vmatprep.mubr.bf16.mxu0 %v1404_v2  ;;  %669 = vmatpush1.bf16.msra.mxu0 %v1331_v22  ;;  %p1364_p4 = pnand %p1363_p3, %p1357_p0 }
  0x10   :  { %670 = vmatprep.subr.bf16.mxu0 %v1337_v25 }
  0x13   :  { %671 = vmatpush1.bf16.msra.mxu0 %v1335_v27 }
  0x14   :  { %1295 = vmatprep.subr.msk.bf16.mxu0 %vm64_vm0, %v1294_v28 }
  0x16   :  { %1269 = vmatmul.mubr.msk.bf16.gmra.mrb[4].mxu0 %vm57_vm1, %v1334_v24 }
  0x17   :  { %700 = vmatprep.mubr.bf16.mxu0 %v1404_v2  ;;  %673 = vmatpush1.bf16.msra.mxu0 %v663_v30 }
  0x1e   :  { %1296 = vmatmul.mubr.msk.bf16.vlgmr.msra.gmra.mrb[8].mxu0 %vm57_vm1, %v1330_v9 }
  0x1f   :  { %710 = vmatprep.mubr.bf16.mxu0 %v1404_v2 }
  0x26   :  { %1297 = vmatmul.mubr.msk.bf16.gmra.mrb[12].mxu0 %vm57_vm1, %v1334_v24 }
  0xe1   :  { %v105_v10 = vpop.f32.mrb[0].mxu0 }
  0xe2   :  { %v107_v11 = vpop.f32.mrb[1].mxu0 }
  0xe3   :  { %v125_v12 = vcombine.high %v105_v10, %v107_v11  ;;  %v109_v13 = vpop.f32.mrb[2].mxu0  ;;  %v1270_v14 = vcombine.low %v107_v11, %v107_v11  ;;  %v124_v15 = vcombine.low %v105_v10, %v107_v11  ;;  %v1272_v21 = vcombine.high %v107_v11, %v107_v11 }
  0xe4   :  { %v111_v16 = vpop.f32.mrb[3].mxu0 }
  0xe5   :  { %v131_v17 = vcombine.high %v109_v13, %v111_v16  ;;  %206 = vmatprep.mubr.f32.mxu1 %v1270_v14  ;;  %v1271_v18 = vcombine.low %v111_v16, %v111_v16  ;;  %v130_v19 = vcombine.low %v109_v13, %v111_v16  ;;  %v1273_v20 = vcombine.high %v111_v16, %v111_v16 }
  0xe6   :  { %v476_v14 = vlaneseq }
  0xe7   :  { %142 = vmatprep.subr.mxu1 %v1271_v18 }
  0xe8   :  { %143 = vmatpush1.xpose.msra.mxu1 %v130_v19  ;;  %v477_v18 = vshrl.u32 %v476_v14, 7 }
  0xe9   :  { %216 = vmatprep.subr.mxu1 %v1273_v20  ;;  %v115_v49 = vpop.f32.mrb[4].mxu0 }
  0xea   :  { %v117_v50 = vpop.f32.mrb[5].mxu0 }
  0xeb   :  { %207 = vmatmul.mubr.f32.vlgmr.msra.gmra.mrb[0].mxu1 %v124_v15  ;;  %v1274_v51 = vcombine.low %v117_v50, %v117_v50  ;;  %v119_v52 = vpop.f32.mrb[6].mxu0  ;;  %v1482_v53 = vcombine.low %v115_v49, %v117_v50  ;;  %v1484_v55 = vcombine.high %v115_v49, %v117_v50  ;;  %v1278_v56 = vcombine.high %v117_v50, %v117_v50 }
  0xec   :  { %217 = vmatpush1.xpose.msra.mxu1 %v131_v17  ;;  %280 = vmatprep.mubr.f32.mxu1 %v1272_v21  ;;  %v120_v54 = vpop.f32.mrb[7].mxu0  ;;  %v1407_v15 = vmov 1934713408  }
  0xed   :  { %1275 = vmatprep.subr.msk.mxu1 %vm318_vm3, %v1274_v51  ;;  %v490_v16 = vunpack.c.l.s4 %v1407_v15 }
  0xef   :  { %281 = vmatmul.mubr.f32.vlgmr.msra.gmra.mrb[2].mxu1 %v125_v12  ;;  %v1406_v12 = vmov 1983009808   ;;  %v491_v21 = vunpack.c.0.s8 %v490_v16 }
  0xf0   :  { %1276 = vmatpush1.msk.msra.mxu1 %vm318_vm3, %v1482_v53  ;;  %387 = vmatprep.mubr.f32.mxu1 %v1405_v59  ;;  %v474_v13 = vunpack.c.l.s4 %v1406_v12 }
  0xf1   :  { %1279 = vmatprep.subr.msk.mxu1 %vm318_vm3, %v1278_v56  ;;  %v702_v57 = vpop.f32.mrb[8].mxu0  ;;  %v1503_v26 = vsub.s32 %v491_v21, %v477_v18 }
  0xf2   :  { %v704_v58 = vpop.f32.mrb[9].mxu0  ;;  %v475_v17 = vunpack.c.0.s8 %v474_v13 }
  0xf3   :  { %v706_v60 = vpop.f32.mrb[10].mxu0  ;;  %v721_v61 = vcombine.low %v702_v57, %v704_v58  ;;  %v722_v62 = vcombine.high %v702_v57, %v704_v58  ;;  %v1298_v9 = vcombine.low %v704_v58, %v704_v58  ;;  %v1300_v11 = vcombine.high %v704_v58, %v704_v58 }
  0xf4   :  { %v708_v63 = vpop.f32.mrb[11].mxu0  ;;  %v1499_v22 = vsub.s32 %v475_v17, %v477_v18 }
  0xf5   :  { %v727_v0 = vcombine.low %v706_v60, %v708_v63  ;;  %v728_v1 = vcombine.high %v706_v60, %v708_v63  ;;  %v1299_v6 = vcombine.low %v708_v63, %v708_v63  ;;  %v1301_v10 = vcombine.high %v708_v63, %v708_v63 }
  0xf9   :  { %v712_v15 = vpop.f32.mrb[12].mxu0 }
  0xfa   :  { %v714_v16 = vpop.f32.mrb[13].mxu0 }
  0xfb   :  { %v1302_v17 = vcombine.low %v714_v16, %v714_v16  ;;  %v716_v18 = vpop.f32.mrb[14].mxu0  ;;  %v734_v21 = vcombine.high %v712_v15, %v714_v16 }
 0x1be   :  { %v208_v31 = vpop.f32.mrb[0].mxu1 }
 0x1bf   :  { %v286_v32 = vmul.f32 0.70710677, %v208_v31  ;;  %v210_v33 = vpop.f32.mrb[1].mxu1 }
 0x1c1   :  { %v289_v34 = vsel %vm288_vm2, %v286_v32, -inf }
 0x1c2   :  { %290 = vmax.xlane.f32.xlu0 %v289_v34  ;;  %v282_v35 = vpop.f32.mrb[2].mxu1  ;;  %v587_v34 = vrot.slane %v1482_v53, %v1499_v22 }
 0x1c3   :  { %v287_v36 = vmul.f32 0.70710677, %v282_v35  ;;  %v284_v37 = vpop.f32.mrb[3].mxu1  ;;  %v594_v35 = vrot.slane %v1484_v55, %v1499_v22 }
 0x1c5   :  { %v292_v38 = vsel %vm288_vm2, %v287_v36, -inf }
 0x1c6   :  { %293 = vmax.xlane.f32.xlu0 %v292_v38 }
 0x24f   :  { %v291_v39 = vpop.xlane.xlu0 %290 }
 0x250   :  { %v295_v40 = vsub.f32 %v286_v32, %v291_v39 }
 0x252   :  { %v297_v41 = vmul.f32 1.442695, %v295_v40 }
 0x253   :  { %v294_v42 = vpop.xlane.xlu0 %293 }
 0x254   :  { %1340 = vpow2.f32 %v297_v41  ;;  %v296_v43 = vsub.f32 %v287_v36, %v294_v42 }
 0x256   :  { %v299_v44 = vmul.f32 1.442695, %v296_v43 }
 0x258   :  { %1342 = vpow2.f32 %v299_v44 }
 0x25e   :  { %v1341_v45 = vpop.eup %1340 }
 0x25f   :  { %v301_v46 = vsel %vm288_vm2, %v1341_v45, 0.0 }
 0x260   :  { %302 = vadd.xlane.f32.xlu1 %v301_v46  ;;  %v595_v46 = vcombine.high %v587_v34, %v587_v34 }
 0x262   :  { %v1343_v47 = vpop.eup %1342 }
 0x263   :  { %v304_v48 = vsel %vm288_vm2, %v1343_v47, 0.0 }
 0x264   :  { %305 = vadd.xlane.f32.xlu1 %v304_v48 }
 0x2ed   :  { %v303_v2 = vpop.xlane.xlu1 %302 }
 0x2ee   :  { %1344 = vrcp.f32 %v303_v2 }
 0x2f1   :  { %v306_v3 = vpop.xlane.xlu1 %305 }
 0x2f2   :  { %1346 = vrcp.f32 %v306_v3 }
 0x2f8   :  { %v1345_v4 = vpop.eup %1344 }
 0x2f9   :  { %v308_v5 = vmul.f32 %v1345_v4, %v1341_v45 }
 0x2fb   :  { %311 = vst.msk [vmem:[#allocation4] sm:$0xf] %vm288_vm2, %v308_v5  ;;  %1277 = vmatmul.mubr.msk.f32.vlgmr.msra.gmra.mrb[4].mxu1 %vm314_vm4, %v308_v5 }
 0x2fc   :  { %v1347_v7 = vpop.eup %1346  ;;  %1280 = vmatpush1.msk.msra.mxu1 %vm318_vm3, %v1484_v55  ;;  %466 = vmatprep.mubr.f32.mxu1 %v1405_v59 }
 0x2fd   :  { %v310_v8 = vmul.f32 %v1347_v7, %v1343_v47  ;;  %739 = vmatprep.subr.mxu1 %v1299_v6  ;;  %v596_v47 = vcombine.high %v594_v35, %v594_v35 }
 0x2ff   :  { %312 = vst.msk [vmem:[#allocation4 + $0x4] sm:$0xf] %vm288_vm2, %v310_v8  ;;  %1281 = vmatmul.mubr.msk.f32.vlgmr.msra.gmra.mrb[6].mxu1 %vm314_vm4, %v310_v8 }
 0x300   :  { %803 = vmatprep.mubr.f32.mxu1 %v1298_v9 }
 0x303   :  { %740 = vmatpush1.xpose.msra.mxu1 %v727_v0 }
 0x304   :  { %813 = vmatprep.subr.mxu1 %v1301_v10 }
 0x306   :  { %804 = vmatmul.mubr.f32.vlgmr.msra.gmra.mrb[8].mxu1 %v721_v61 }
 0x307   :  { %814 = vmatpush1.xpose.msra.mxu1 %v728_v1  ;;  %877 = vmatprep.mubr.f32.mxu1 %v1300_v11 }
 0x308   :  { %1303 = vmatprep.subr.msk.mxu1 %vm318_vm3, %v1302_v17 }
 0x30a   :  { %878 = vmatmul.mubr.f32.vlgmr.msra.gmra.mrb[10].mxu1 %v722_v62 }
 0x30b   :  { %982 = vmatprep.mubr.f32.mxu1 %v1405_v59 }
 0x3ce   :  { %v389_v19 = vpop.f32.mrb[4].mxu1 }
 0x3cf   :  { %v391_v20 = vpop.f32.mrb[5].mxu1  ;;  %v479_v24 = vrot.slane %v389_v19, %v1499_v22  ;;  %v733_v19 = vcombine.low %v712_v15, %v714_v16 }
 0x3d0   :  { %v511_v28 = vrot.slane %v391_v20, %v1499_v22  ;;  %v717_v20 = vpop.f32.mrb[15].mxu0 }
 0x3d1   :  { %1304 = vmatpush1.msk.msra.mxu1 %vm318_vm3, %v733_v19 }
 0x3d2   :  { %v468_v23 = vpop.f32.mrb[6].mxu1 }
 0x3d3   :  { %v486_v25 = vrot.slane %v468_v23, %v1499_v22  ;;  %v470_v27 = vpop.f32.mrb[7].mxu1  ;;  %v1306_v23 = vcombine.high %v714_v16, %v714_v16 }
 0x3d4   :  { %v518_v29 = vrot.slane %v470_v27, %v1499_v22 }
 0x3d5   :  { %v487_v30 = vcombine.low %v479_v24, %v486_v25  ;;  %v488_v31 = vcombine.high %v479_v24, %v486_v25  ;;  %1307 = vmatprep.subr.msk.mxu1 %vm318_vm3, %v1306_v23 }
 0x3d6   :  { %v519_v32 = vcombine.low %v511_v28, %v518_v29  ;;  %v520_v33 = vcombine.high %v511_v28, %v518_v29 }
 0x3d7   :  { %v495_v36 = vrot.slane %v487_v30, %v1503_v26  ;;  %v502_v37 = vrot.slane %v488_v31, %v1503_v26 }
 0x3d8   :  { %v527_v38 = vrot.slane %v519_v32, %v1503_v26  ;;  %v534_v39 = vrot.slane %v520_v33, %v1503_v26 }
 0x3d9   :  { %v805_v40 = vpop.f32.mrb[8].mxu1 }
 0x3da   :  { %v545_v41 = vcombine.low %v495_v36, %v527_v38  ;;  %v1282_v42 = vcombine.high %v495_v36, %v527_v38  ;;  %v561_v43 = vcombine.low %v502_v37, %v534_v39  ;;  %v1283_v44 = vcombine.high %v502_v37, %v534_v39  ;;  %v807_v45 = vpop.f32.mrb[9].mxu1 }
 0x3db   :  { %v883_v48 = vmul.f32 0.70710677, %v805_v40 }
 0x3dc   :  { %v552_v49 = vrot.slane %v545_v41, %v1499_v22  ;;  %v560_v50 = vrot.slane %v1282_v42, %v1499_v22  ;;  %v568_v51 = vrot.slane %v561_v43, %v1499_v22  ;;  %v576_v52 = vrot.slane %v1283_v44, %v1499_v22 }
 0x3dd   :  { %v885_v53 = vsel %vm288_vm2, %v883_v48, -inf  ;;  %v879_v54 = vpop.f32.mrb[10].mxu1 }
 0x3de   :  { %v601_v55 = vadd.f32 %v587_v34, %v552_v49  ;;  %v602_v56 = vadd.f32 %v595_v46, %v560_v50  ;;  %v603_v57 = vadd.f32 %v594_v35, %v568_v51  ;;  %v604_v58 = vadd.f32 %v596_v47, %v576_v52  ;;  %886 = vmax.xlane.f32.xlu0 %v885_v53  ;;  %v881_v60 = vpop.f32.mrb[11].mxu1 }
 0x3df   :  { %v884_v61 = vmul.f32 0.70710677, %v879_v54 }
 0x3e0   :  { %v609_v62 = vcombine.low %v601_v55, %v602_v56  ;;  %v610_v63 = vcombine.low %v603_v57, %v604_v58 }
 0x3e1   :  { %v888_v0 = vsel %vm288_vm2, %v884_v61, -inf }
 0x3e2   :  { %889 = vmax.xlane.f32.xlu1 %v888_v0  ;;  %v617_v1 = vrot.slane %v609_v62, %v1499_v22  ;;  %v624_v2 = vrot.slane %v610_v63, %v1499_v22 }
 0x3e4   :  { %v625_v3 = vcombine.low %v617_v1, %v624_v2  ;;  %v626_v4 = vcombine.high %v617_v1, %v624_v2 }
 0x3e6   :  { %629 = vst [vmem:[#allocation2] sm:$0xff] %v625_v3  ;;  %630 = vst [vmem:[#allocation2 + $0x8] sm:$0xff] %v626_v4 }
 0x46b   :  { %v887_v5 = vpop.xlane.xlu0 %886 }
 0x46c   :  { %v891_v6 = vsub.f32 %v883_v48, %v887_v5 }
 0x46e   :  { %v893_v7 = vmul.f32 1.442695, %v891_v6 }
 0x46f   :  { %v890_v8 = vpop.xlane.xlu1 %889 }
 0x470   :  { %1348 = vpow2.f32 %v893_v7  ;;  %v892_v9 = vsub.f32 %v884_v61, %v890_v8 }
 0x472   :  { %v895_v10 = vmul.f32 1.442695, %v892_v9 }
 0x474   :  { %1350 = vpow2.f32 %v895_v10 }
 0x47a   :  { %v1349_v11 = vpop.eup %1348 }
 0x47b   :  { %v897_v12 = vsel %vm288_vm2, %v1349_v11, 0.0 }
 0x47c   :  { %898 = vadd.xlane.f32.xlu0 %v897_v12 }
 0x47e   :  { %v1351_v13 = vpop.eup %1350 }
 0x47f   :  { %v900_v14 = vsel %vm288_vm2, %v1351_v13, 0.0 }
 0x480   :  { %901 = vadd.xlane.f32.xlu1 %v900_v14 }
 0x509   :  { %v899_v24 = vpop.xlane.xlu0 %898 }
 0x50a   :  { %1352 = vrcp.f32 %v899_v24 }
 0x50d   :  { %v902_v25 = vpop.xlane.xlu1 %901 }
 0x50e   :  { %1354 = vrcp.f32 %v902_v25 }
 0x514   :  { %v1353_v27 = vpop.eup %1352 }
 0x515   :  { %v904_v28 = vmul.f32 %v1353_v27, %v1349_v11 }
 0x517   :  { %908 = vst.msk [vmem:[#allocation4 + $0x8] sm:$0xf] %vm288_vm2, %v904_v28  ;;  %1305 = vmatmul.mubr.msk.f32.vlgmr.msra.gmra.mrb[12].mxu1 %vm314_vm4, %v904_v28 }
 0x518   :  { %v1355_v29 = vpop.eup %1354  ;;  %1308 = vmatpush1.msk.msra.mxu1 %vm318_vm3, %v734_v21  ;;  %1061 = vmatprep.mubr.f32.mxu1 %v1405_v59 }
 0x519   :  { %v906_v30 = vmul.f32 %v1355_v29, %v1351_v13 }
 0x51b   :  { %909 = vst.msk [vmem:[#allocation4 + $0xc] sm:$0xf] %vm288_vm2, %v906_v30  ;;  %1309 = vmatmul.mubr.msk.f32.vlgmr.msra.gmra.mrb[14].mxu1 %vm314_vm4, %v906_v30 }
 0x51c   :  { %1367 = shalt.err (!%p1364_p4)
}
 0x51d   :  { %s1368_s12 = scalar_lea.hbm %s1577_s3, 256 }
 0x51e   :  { %p1369_p5 = scmp.ne.s32.totalorder %s1577_s3, %s1368_s12  ;;  %p1372_p6 = scmp.lt.u32.totalorder %s1368_s12, %s1577_s3 }
 0x520   :  { %p1374_p7 = pnand %p1372_p6, %p1369_p5 }
 0x522   :  { %1377 = shalt.err (!%p1374_p7)
}
 0x523   :  { %s1409_s17 = smov 64   ;;  %s1410_s18 = smov 4   ;;  %v1182_v42 = vrot.slane %v733_v19, %v1499_v22  ;;  %v1189_v43 = vrot.slane %v734_v21, %v1499_v22 }
 0x524   :  { %1250 = dma.vmem_to_hbm [thread:$0]  %s1245_s1, 256, %s1577_s3, [#allocation5], %s1409_s17, %s1409_s17, %s1410_s18  }
 0x525   :  { %v1190_v52 = vcombine.high %v1182_v42, %v1182_v42  ;;  %v1191_v53 = vcombine.high %v1189_v43, %v1189_v43  ;;  %s1411_s3 = smov [#allocation2]  }
 0x526   :  { %s1232_s21 = sshll.u32 %s1411_s3, 4  ;;  %s1233_s21 = int_to_ptr.vmem [resolvable:$true] %s1232_s21 }
 0x527   :  { %s1378_s22 = scalar_lea.vmem %s1233_s21, 512  ;;  %p1383_p9 = scmp.lt.s32.totalorder %s1233_s21, %s1233_s21 }
 0x528   :  { %p1379_p8 = scmp.ne.s32.totalorder %s1233_s21, %s1378_s22  ;;  %p1384_p10 = scmp.lt.s32.totalorder %s1378_s22, %s1378_s22 }
 0x52a   :  { %p1385_p11 = por %p1384_p10, %p1383_p9 }
 0x52c   :  { %p1386_p12 = pnand %p1385_p11, %p1379_p8 }
 0x5ea   :  { %v984_v59 = vpop.f32.mrb[12].mxu1 }
 0x5eb   :  { %v986_v31 = vpop.f32.mrb[13].mxu1  ;;  %v1074_v33 = vrot.slane %v984_v59, %v1499_v22 }
 0x5ec   :  { %v1106_v36 = vrot.slane %v986_v31, %v1499_v22 }
 0x5ee   :  { %v1063_v32 = vpop.f32.mrb[14].mxu1 }
 0x5ef   :  { %v1081_v34 = vrot.slane %v1063_v32, %v1499_v22  ;;  %v1065_v35 = vpop.f32.mrb[15].mxu1 }
 0x5f0   :  { %v1113_v37 = vrot.slane %v1065_v35, %v1499_v22 }
 0x5f1   :  { %v1082_v38 = vcombine.low %v1074_v33, %v1081_v34  ;;  %v1083_v39 = vcombine.high %v1074_v33, %v1081_v34 }
 0x5f2   :  { %v1114_v40 = vcombine.low %v1106_v36, %v1113_v37  ;;  %v1115_v41 = vcombine.high %v1106_v36, %v1113_v37 }
 0x5f3   :  { %v1090_v44 = vrot.slane %v1082_v38, %v1503_v26  ;;  %v1097_v45 = vrot.slane %v1083_v39, %v1503_v26 }
 0x5f4   :  { %v1122_v46 = vrot.slane %v1114_v40, %v1503_v26  ;;  %v1129_v47 = vrot.slane %v1115_v41, %v1503_v26 }
 0x5f6   :  { %v1140_v48 = vcombine.low %v1090_v44, %v1122_v46  ;;  %v1310_v49 = vcombine.high %v1090_v44, %v1122_v46  ;;  %v1156_v50 = vcombine.low %v1097_v45, %v1129_v47  ;;  %v1311_v51 = vcombine.high %v1097_v45, %v1129_v47 }
 0x5f8   :  { %v1147_v54 = vrot.slane %v1140_v48, %v1499_v22  ;;  %v1155_v55 = vrot.slane %v1310_v49, %v1499_v22  ;;  %v1163_v56 = vrot.slane %v1156_v50, %v1499_v22  ;;  %v1171_v57 = vrot.slane %v1311_v51, %v1499_v22 }
 0x5fa   :  { %v1196_v58 = vadd.f32 %v1182_v42, %v1147_v54  ;;  %v1197_v60 = vadd.f32 %v1190_v52, %v1155_v55  ;;  %v1198_v61 = vadd.f32 %v1189_v43, %v1163_v56  ;;  %v1199_v62 = vadd.f32 %v1191_v53, %v1171_v57 }
 0x5fc   :  { %v1204_v63 = vcombine.low %v1196_v58, %v1197_v60  ;;  %v1205_v26 = vcombine.low %v1198_v61, %v1199_v62 }
 0x5fe   :  { %v1212_v0 = vrot.slane %v1204_v63, %v1499_v22  ;;  %v1219_v1 = vrot.slane %v1205_v26, %v1499_v22 }
 0x600   :  { %v1220_v2 = vcombine.low %v1212_v0, %v1219_v1  ;;  %v1221_v3 = vcombine.high %v1212_v0, %v1219_v1 }
 0x602   :  { %1225 = vst [vmem:[#allocation2 + $0x10] sm:$0xff] %v1220_v2  ;;  %1226 = vst [vmem:[#allocation2 + $0x18] sm:$0xff] %v1221_v3 }
 0x603   :  { %1389 = shalt.err (!%p1386_p12)
}
 0x604   :  { %s1390_s25 = scalar_lea.hbm %s1576_s2, 512 }
 0x605   :  { %p1391_p13 = scmp.ne.s32.totalorder %s1576_s2, %s1390_s25  ;;  %p1394_p0 = scmp.lt.u32.totalorder %s1390_s25, %s1576_s2 }
 0x607   :  { %p1396_p1 = pnand %p1394_p0, %p1391_p13 }
 0x609   :  { %1399 = shalt.err (!%p1396_p1)
}
 0x60a   :  { %s1412_s30 = smov 256   ;;  %s1413_s4 = smov 16  }
 0x60b   :  { %1238 = dma.vmem_to_hbm [thread:$0]  %s1233_s21, 512, %s1576_s2, [#allocation3], %s1412_s30, %s1412_s30, %s1413_s4  }
 0x60c   :  { %1400 = dma.done.wait [#allocation3], 512  }
 0x60d   :  { %1401 = vsyncadd [#allocation3], 4294966784 }
 0x60e   :  { %1402 = dma.done.wait [#allocation5], 256  }
 0x60f   :  { %1403 = vsyncadd [#allocation5], 4294967040 }
 0x610   :  { %1257 = vsyncpa [#allocation3], 1 }
 0x611   :  { %1258 = vsyncpa [#allocation5], 1 }

</bundles_post_ra>
